<compile_context>
chip_gen: v7x
topology: tpu7x:2x2x1
jax: 0.10.0
libtpu: 0.0.40
codegen_flags: <defaults>
</compile_context>

<pallas_src>
import functools

import jax
import jax.numpy as jnp
from jax.experimental import pallas as pl
from jax.experimental.pallas import tpu as pltpu


# ----------------------------- fused kernel ---------------------------------
def fused_prediction_kernel(x_ref, h0_ref, *rest,
                            num_layers, n_components, seq_len, batch):
    """Fused multi-layer tanh-RNN + bivariate-Bernoulli mixture head.

    Ref layout after (x_ref, h0_ref):
      rest[0 : 3L]          per-layer (w_ih_t, w_hh_t, bias)
      rest[3L], rest[3L+1]  head weight (H, 128-padded), head bias (1, padded)
      rest[3L+2]            z_ref      (T*B, padded)  lane-dense output slab
      rest[3L+3]            hidden_ref (L, B, H)      final hidden (aliased to h0)
    Sequence rows are time-major: row index = t * B + b.
    """
    L, n, T, B = num_layers, n_components, seq_len, batch

    layer_refs = rest[:3 * L]
    head_w_ref = rest[3 * L]
    head_b_ref = rest[3 * L + 1]
    z_ref = rest[3 * L + 2]
    hidden_ref = rest[3 * L + 3]

    # Load weights once into values (vregs).
    w_ih = [layer_refs[3 * l][...] for l in range(L)]
    w_hh = [layer_refs[3 * l + 1][...] for l in range(L)]
    bias = [layer_refs[3 * l + 2][...] for l in range(L)]

    # Hoisted layer-0 input projection: one MXU matmul off the serial path.
    # Kept as a value; the per-step xw0[t*B:(t+1)*B] below is an in-register
    # sublane extract, not a masked VMEM load.
    xw0 = jnp.dot(x_ref[...], w_ih[0],
                  preferred_element_type=jnp.float32) + bias[0]

    # Wavefront over (layer, time).  Layer l's step t depends only on
    # (layer l, t-1) and (layer l-1, t), both produced at wave w-1, so the
    # critical chain is T + L - 1 dependent matmul->tanh steps.
    h = [h0_ref[l] for l in range(L)]                 # current hidden per layer
    outs = [[None] * T for _ in range(L)]             # per-step outputs (values)
    for w in range(T + L - 1):
        for l in range(L):
            t = w - l
            if 0 <= t < T:
                if l == 0:
                    inp = xw0[t * B:(t + 1) * B, :]
                else:
                    inp = (jnp.dot(outs[l - 1][t], w_ih[l],
                                   preferred_element_type=jnp.float32)
                           + bias[l])
                h_new = jnp.tanh(
                    jnp.dot(h[l], w_hh[l],
                            preferred_element_type=jnp.float32) + inp)
                h[l] = h_new
                outs[l][t] = h_new

    # Final hidden states (writes data-depend on the h0 reads -> alias-safe).
    for l in range(L):
        hidden_ref[l] = h[l]

    # ---- mixture head on the vreg-resident last-layer sequence -------------
    hseq = jnp.concatenate(outs[L - 1], axis=0)        # (T*B, H), time-major
    z = (jnp.dot(hseq, head_w_ref[...], preferred_element_type=jnp.float32)
         + head_b_ref[...])                            # (T*B, 128-padded)

    # Whole-vreg epilogue with lane masks; exp/tanh go to the EUP slot.
    lane = jax.lax.broadcasted_iota(jnp.int32, z.shape, dimension=1)
    is_pi = lane < n
    is_std = (lane >= 3 * n) & (lane < 5 * n)
    is_rho = (lane >= 5 * n) & (lane < 6 * n)

    pi = jnp.where(is_pi, z, -jnp.inf)
    m = jnp.max(pi, axis=-1, keepdims=True)
    lse = jnp.log(jnp.sum(jnp.exp(pi - m), axis=-1, keepdims=True)) + m

    out = jnp.where(is_pi, z - lse, z)                 # log-softmax mixture weights
    out = jnp.where(is_std, jnp.exp(z), out)           # positive stdevs
    out = jnp.where(is_rho, jnp.tanh(z), out)          # correlations in (-1, 1)
    z_ref[...] = out                                   # single unmasked full-tile store


# ------------------------------ params / wrapper -----------------------------
def init_params(key, input_dim, hidden_dim, num_layers, n_components):
    params = {"rnn": [], "head": {}}
    scale = 0.1
    for layer in range(num_layers):
        d_in = input_dim if layer == 0 else hidden_dim
        key, k1, k2, k3 = jax.random.split(key, 4)
        params["rnn"].append({
            # stored pre-transposed: (d_in, H) / (H, H); bias = b_ih + b_hh
            "w_ih_t": scale * jax.random.normal(k1, (d_in, hidden_dim), jnp.float32),
            "w_hh_t": scale * jax.random.normal(k2, (hidden_dim, hidden_dim), jnp.float32),
            "bias": scale * jax.random.normal(k3, (1, hidden_dim), jnp.float32),
        })
    out_dim = 6 * n_components + 1
    key, k1, k2 = jax.random.split(key, 3)
    params["head"]["w_t"] = scale * jax.random.normal(k1, (hidden_dim, out_dim), jnp.float32)
    params["head"]["bias"] = scale * jax.random.normal(k2, (1, out_dim), jnp.float32)
    return params


@functools.partial(jax.jit, static_argnames=("n_components",))
def prediction_model_forward(params, x, hidden=None, *, n_components):
    # x: (B, T, input_dim), hidden: (num_layers, B, H) or None
    B, T, D = x.shape
    L = len(params["rnn"])
    H = params["rnn"][0]["w_hh_t"].shape[0]
    n = n_components
    out_dim = 6 * n + 1
    padded_out = max(128, pl.cdiv(out_dim, 128) * 128)   # lane-dense output slab
    if hidden is None:
        hidden = jnp.zeros((L, B, H), jnp.float32)

    # Time-major flattened input (free layout plumbing outside the kernel).
    x_tm = jnp.swapaxes(x, 0, 1).reshape(T * B, D)

    # Zero-pad the head to 128 lanes so every kernel-side store is unmasked.
    head_w = jnp.zeros((H, padded_out), jnp.float32).at[:, :out_dim].set(params["head"]["w_t"])
    head_b = jnp.zeros((1, padded_out), jnp.float32).at[:, :out_dim].set(params["head"]["bias"])

    inputs = [x_tm, hidden]
    for p in params["rnn"]:
        inputs += [p["w_ih_t"], p["w_hh_t"], p["bias"]]
    inputs += [head_w, head_b]

    vmem = pl.BlockSpec(memory_space=pltpu.MemorySpace.VMEM)
    kernel = functools.partial(
        fused_prediction_kernel,
        num_layers=L, n_components=n, seq_len=T, batch=B,
    )
    z, hidden_out = pl.pallas_call(
        kernel,
        out_shape=(
            jax.ShapeDtypeStruct((T * B, padded_out), jnp.float32),  # head slab
            jax.ShapeDtypeStruct((L, B, H), jnp.float32),            # final hidden
        ),
        in_specs=[vmem] * len(inputs),
        out_specs=(vmem, vmem),
        input_output_aliases={1: 1},   # h0 input buffer reused for final hidden
    )(*inputs)

    # Slice / reshape the lane-dense slab back to the PyTorch output layout.
    z_bt = jnp.swapaxes(z.reshape(T, B, padded_out), 0, 1)[..., :out_dim]  # (B,T,6n+1)
    log_weights = z_bt[..., 0:n]
    means = z_bt[..., n:3 * n].reshape(B, T, n, 2)
    stdevs = z_bt[..., 3 * n:5 * n].reshape(B, T, n, 2)
    correlations = z_bt[..., 5 * n:6 * n]
    last_logit = z_bt[..., 6 * n:6 * n + 1]
    return means, stdevs, log_weights, correlations, last_logit, hidden_out


if __name__ == "__main__":
    # config: input_dim=4, hidden_dim=32, num_layers=2, n_components=3
    B, T = 2, 8
    INPUT_DIM, HIDDEN_DIM, NUM_LAYERS, N_COMPONENTS = 4, 32, 2, 3

    key = jax.random.PRNGKey(0)
    key, kx = jax.random.split(key)
    x = jax.random.normal(kx, (B, T, INPUT_DIM), jnp.float32)
    params = init_params(key, INPUT_DIM, HIDDEN_DIM, NUM_LAYERS, N_COMPONENTS)

    outs = prediction_model_forward(params, x, hidden=None, n_components=N_COMPONENTS)
    outs = jax.block_until_ready(outs)

    means, stdevs, logw, rho, last_logit, hidden_out = outs
    assert means.shape == (B, T, N_COMPONENTS, 2)
    assert stdevs.shape == (B, T, N_COMPONENTS, 2)
    assert logw.shape == (B, T, N_COMPONENTS)
    assert rho.shape == (B, T, N_COMPONENTS)
    assert last_logit.shape == (B, T, 1)
    assert hidden_out.shape == (NUM_LAYERS, B, HIDDEN_DIM)
    assert bool(jnp.all(jnp.isfinite(means)))
    assert bool(jnp.all(stdevs > 0))
    assert bool(jnp.all(jnp.abs(rho) < 1))
    assert bool(jnp.all(jnp.abs(jnp.sum(jnp.exp(logw), axis=-1) - 1.0) < 1e-4))
    print("KERNEL_OK")
</pallas_src>

<mosaic_0001>
module attributes {stable_mosaic.version = 11 : i64} {
  func.func @fused_prediction_kernel(%arg0: memref<16x4xf32, #tpu.memory_space<vmem>>, %arg1: memref<2x2x32xf32, #tpu.memory_space<vmem>>, %arg2: memref<4x32xf32, #tpu.memory_space<vmem>>, %arg3: memref<32x32xf32, #tpu.memory_space<vmem>>, %arg4: memref<1x32xf32, #tpu.memory_space<vmem>>, %arg5: memref<32x32xf32, #tpu.memory_space<vmem>>, %arg6: memref<32x32xf32, #tpu.memory_space<vmem>>, %arg7: memref<1x32xf32, #tpu.memory_space<vmem>>, %arg8: memref<32x128xf32, #tpu.memory_space<vmem>>, %arg9: memref<1x128xf32, #tpu.memory_space<vmem>>, %arg10: memref<16x128xf32, #tpu.memory_space<vmem>>, %arg11: memref<2x2x32xf32, #tpu.memory_space<vmem>>) attributes {dimension_semantics = [], scalar_prefetch = 0 : i64, scratch_operands = 0 : i64, tpu.core_type = #tpu.core_type<tc>} {
    %c0 = arith.constant 0 : index
    %c0_0 = arith.constant 0 : index
    %0 = vector.load %arg2[%c0, %c0_0] : memref<4x32xf32, #tpu.memory_space<vmem>>, vector<4x32xf32>
    %c0_1 = arith.constant 0 : index
    %c0_2 = arith.constant 0 : index
    %1 = vector.load %arg5[%c0_1, %c0_2] : memref<32x32xf32, #tpu.memory_space<vmem>>, vector<32x32xf32>
    %c0_3 = arith.constant 0 : index
    %c0_4 = arith.constant 0 : index
    %2 = vector.load %arg3[%c0_3, %c0_4] : memref<32x32xf32, #tpu.memory_space<vmem>>, vector<32x32xf32>
    %c0_5 = arith.constant 0 : index
    %c0_6 = arith.constant 0 : index
    %3 = vector.load %arg6[%c0_5, %c0_6] : memref<32x32xf32, #tpu.memory_space<vmem>>, vector<32x32xf32>
    %c0_7 = arith.constant 0 : index
    %c0_8 = arith.constant 0 : index
    %4 = vector.load %arg4[%c0_7, %c0_8] : memref<1x32xf32, #tpu.memory_space<vmem>>, vector<1x32xf32>
    %c0_9 = arith.constant 0 : index
    %c0_10 = arith.constant 0 : index
    %5 = vector.load %arg7[%c0_9, %c0_10] : memref<1x32xf32, #tpu.memory_space<vmem>>, vector<1x32xf32>
    %c0_11 = arith.constant 0 : index
    %c0_12 = arith.constant 0 : index
    %6 = vector.load %arg0[%c0_11, %c0_12] : memref<16x4xf32, #tpu.memory_space<vmem>>, vector<16x4xf32>
    %cst = arith.constant dense<0.000000e+00> : vector<16x32xf32>
    %7 = tpu.matmul %6, %0, %cst {dimension_numbers = #tpu.dot_dimension_numbers<[1], [0], [0], [1], [0, 0, 1, 1], [], []>} : vector<16x4xf32>, vector<4x32xf32>, vector<16x32xf32> -> vector<16x32xf32>
    %8 = vector.broadcast %4 : vector<1x32xf32> to vector<16x32xf32>
    %9 = arith.addf %7, %8 : vector<16x32xf32>
    %c0_13 = arith.constant 0 : index
    %c0_14 = arith.constant 0 : index
    %c0_15 = arith.constant 0 : index
    %10 = vector.load %arg1[%c0_13, %c0_14, %c0_15] : memref<2x2x32xf32, #tpu.memory_space<vmem>>, vector<1x2x32xf32>
    %11 = vector.shape_cast %10 : vector<1x2x32xf32> to vector<2x32xf32>
    %c1 = arith.constant 1 : index
    %c0_16 = arith.constant 0 : index
    %c0_17 = arith.constant 0 : index
    %12 = vector.load %arg1[%c1, %c0_16, %c0_17] : memref<2x2x32xf32, #tpu.memory_space<vmem>>, vector<1x2x32xf32>
    %13 = vector.shape_cast %12 : vector<1x2x32xf32> to vector<2x32xf32>
    %14 = vector.extract_strided_slice %9 {offsets = [0, 0], sizes = [2, 32], strides = [1, 1]} : vector<16x32xf32> to vector<2x32xf32>
    %cst_18 = arith.constant dense<0.000000e+00> : vector<2x32xf32>
    %15 = tpu.matmul %11, %2, %cst_18 {dimension_numbers = #tpu.dot_dimension_numbers<[1], [0], [0], [1], [0, 0, 1, 1], [], []>} : vector<2x32xf32>, vector<32x32xf32>, vector<2x32xf32> -> vector<2x32xf32>
    %16 = arith.addf %15, %14 : vector<2x32xf32>
    %17 = math.tanh %16 : vector<2x32xf32>
    %18 = vector.extract_strided_slice %9 {offsets = [2, 0], sizes = [2, 32], strides = [1, 1]} : vector<16x32xf32> to vector<2x32xf32>
    %cst_19 = arith.constant dense<0.000000e+00> : vector<2x32xf32>
    %19 = tpu.matmul %17, %2, %cst_19 {dimension_numbers = #tpu.dot_dimension_numbers<[1], [0], [0], [1], [0, 0, 1, 1], [], []>} : vector<2x32xf32>, vector<32x32xf32>, vector<2x32xf32> -> vector<2x32xf32>
    %20 = arith.addf %19, %18 : vector<2x32xf32>
    %21 = math.tanh %20 : vector<2x32xf32>
    %cst_20 = arith.constant dense<0.000000e+00> : vector<2x32xf32>
    %22 = tpu.matmul %17, %1, %cst_20 {dimension_numbers = #tpu.dot_dimension_numbers<[1], [0], [0], [1], [0, 0, 1, 1], [], []>} : vector<2x32xf32>, vector<32x32xf32>, vector<2x32xf32> -> vector<2x32xf32>
    %23 = vector.broadcast %5 : vector<1x32xf32> to vector<2x32xf32>
    %24 = arith.addf %22, %23 : vector<2x32xf32>
    %cst_21 = arith.constant dense<0.000000e+00> : vector<2x32xf32>
    %25 = tpu.matmul %13, %3, %cst_21 {dimension_numbers = #tpu.dot_dimension_numbers<[1], [0], [0], [1], [0, 0, 1, 1], [], []>} : vector<2x32xf32>, vector<32x32xf32>, vector<2x32xf32> -> vector<2x32xf32>
    %26 = arith.addf %25, %24 : vector<2x32xf32>
    %27 = math.tanh %26 : vector<2x32xf32>
    %28 = vector.extract_strided_slice %9 {offsets = [4, 0], sizes = [2, 32], strides = [1, 1]} : vector<16x32xf32> to vector<2x32xf32>
    %cst_22 = arith.constant dense<0.000000e+00> : vector<2x32xf32>
    %29 = tpu.matmul %21, %2, %cst_22 {dimension_numbers = #tpu.dot_dimension_numbers<[1], [0], [0], [1], [0, 0, 1, 1], [], []>} : vector<2x32xf32>, vector<32x32xf32>, vector<2x32xf32> -> vector<2x32xf32>
    %30 = arith.addf %29, %28 : vector<2x32xf32>
    %31 = math.tanh %30 : vector<2x32xf32>
    %cst_23 = arith.constant dense<0.000000e+00> : vector<2x32xf32>
    %32 = tpu.matmul %21, %1, %cst_23 {dimension_numbers = #tpu.dot_dimension_numbers<[1], [0], [0], [1], [0, 0, 1, 1], [], []>} : vector<2x32xf32>, vector<32x32xf32>, vector<2x32xf32> -> vector<2x32xf32>
    %33 = vector.broadcast %5 : vector<1x32xf32> to vector<2x32xf32>
    %34 = arith.addf %32, %33 : vector<2x32xf32>
    %cst_24 = arith.constant dense<0.000000e+00> : vector<2x32xf32>
    %35 = tpu.matmul %27, %3, %cst_24 {dimension_numbers = #tpu.dot_dimension_numbers<[1], [0], [0], [1], [0, 0, 1, 1], [], []>} : vector<2x32xf32>, vector<32x32xf32>, vector<2x32xf32> -> vector<2x32xf32>
    %36 = arith.addf %35, %34 : vector<2x32xf32>
    %37 = math.tanh %36 : vector<2x32xf32>
    %38 = vector.extract_strided_slice %9 {offsets = [6, 0], sizes = [2, 32], strides = [1, 1]} : vector<16x32xf32> to vector<2x32xf32>
    %cst_25 = arith.constant dense<0.000000e+00> : vector<2x32xf32>
    %39 = tpu.matmul %31, %2, %cst_25 {dimension_numbers = #tpu.dot_dimension_numbers<[1], [0], [0], [1], [0, 0, 1, 1], [], []>} : vector<2x32xf32>, vector<32x32xf32>, vector<2x32xf32> -> vector<2x32xf32>
    %40 = arith.addf %39, %38 : vector<2x32xf32>
    %41 = math.tanh %40 : vector<2x32xf32>
    %cst_26 = arith.constant dense<0.000000e+00> : vector<2x32xf32>
    %42 = tpu.matmul %31, %1, %cst_26 {dimension_numbers = #tpu.dot_dimension_numbers<[1], [0], [0], [1], [0, 0, 1, 1], [], []>} : vector<2x32xf32>, vector<32x32xf32>, vector<2x32xf32> -> vector<2x32xf32>
    %43 = vector.broadcast %5 : vector<1x32xf32> to vector<2x32xf32>
    %44 = arith.addf %42, %43 : vector<2x32xf32>
    %cst_27 = arith.constant dense<0.000000e+00> : vector<2x32xf32>
    %45 = tpu.matmul %37, %3, %cst_27 {dimension_numbers = #tpu.dot_dimension_numbers<[1], [0], [0], [1], [0, 0, 1, 1], [], []>} : vector<2x32xf32>, vector<32x32xf32>, vector<2x32xf32> -> vector<2x32xf32>
    %46 = arith.addf %45, %44 : vector<2x32xf32>
    %47 = math.tanh %46 : vector<2x32xf32>
    %48 = vector.extract_strided_slice %9 {offsets = [8, 0], sizes = [2, 32], strides = [1, 1]} : vector<16x32xf32> to vector<2x32xf32>
    %cst_28 = arith.constant dense<0.000000e+00> : vector<2x32xf32>
    %49 = tpu.matmul %41, %2, %cst_28 {dimension_numbers = #tpu.dot_dimension_numbers<[1], [0], [0], [1], [0, 0, 1, 1], [], []>} : vector<2x32xf32>, vector<32x32xf32>, vector<2x32xf32> -> vector<2x32xf32>
    %50 = arith.addf %49, %48 : vector<2x32xf32>
    %51 = math.tanh %50 : vector<2x32xf32>
    %cst_29 = arith.constant dense<0.000000e+00> : vector<2x32xf32>
    %52 = tpu.matmul %41, %1, %cst_29 {dimension_numbers = #tpu.dot_dimension_numbers<[1], [0], [0], [1], [0, 0, 1, 1], [], []>} : vector<2x32xf32>, vector<32x32xf32>, vector<2x32xf32> -> vector<2x32xf32>
    %53 = vector.broadcast %5 : vector<1x32xf32> to vector<2x32xf32>
    %54 = arith.addf %52, %53 : vector<2x32xf32>
    %cst_30 = arith.constant dense<0.000000e+00> : vector<2x32xf32>
    %55 = tpu.matmul %47, %3, %cst_30 {dimension_numbers = #tpu.dot_dimension_numbers<[1], [0], [0], [1], [0, 0, 1, 1], [], []>} : vector<2x32xf32>, vector<32x32xf32>, vector<2x32xf32> -> vector<2x32xf32>
    %56 = arith.addf %55, %54 : vector<2x32xf32>
    %57 = math.tanh %56 : vector<2x32xf32>
    %58 = vector.extract_strided_slice %9 {offsets = [10, 0], sizes = [2, 32], strides = [1, 1]} : vector<16x32xf32> to vector<2x32xf32>
    %cst_31 = arith.constant dense<0.000000e+00> : vector<2x32xf32>
    %59 = tpu.matmul %51, %2, %cst_31 {dimension_numbers = #tpu.dot_dimension_numbers<[1], [0], [0], [1], [0, 0, 1, 1], [], []>} : vector<2x32xf32>, vector<32x32xf32>, vector<2x32xf32> -> vector<2x32xf32>
    %60 = arith.addf %59, %58 : vector<2x32xf32>
    %61 = math.tanh %60 : vector<2x32xf32>
    %cst_32 = arith.constant dense<0.000000e+00> : vector<2x32xf32>
    %62 = tpu.matmul %51, %1, %cst_32 {dimension_numbers = #tpu.dot_dimension_numbers<[1], [0], [0], [1], [0, 0, 1, 1], [], []>} : vector<2x32xf32>, vector<32x32xf32>, vector<2x32xf32> -> vector<2x32xf32>
    %63 = vector.broadcast %5 : vector<1x32xf32> to vector<2x32xf32>
    %64 = arith.addf %62, %63 : vector<2x32xf32>
    %cst_33 = arith.constant dense<0.000000e+00> : vector<2x32xf32>
    %65 = tpu.matmul %57, %3, %cst_33 {dimension_numbers = #tpu.dot_dimension_numbers<[1], [0], [0], [1], [0, 0, 1, 1], [], []>} : vector<2x32xf32>, vector<32x32xf32>, vector<2x32xf32> -> vector<2x32xf32>
    %66 = arith.addf %65, %64 : vector<2x32xf32>
    %67 = math.tanh %66 : vector<2x32xf32>
    %68 = vector.extract_strided_slice %9 {offsets = [12, 0], sizes = [2, 32], strides = [1, 1]} : vector<16x32xf32> to vector<2x32xf32>
    %cst_34 = arith.constant dense<0.000000e+00> : vector<2x32xf32>
    %69 = tpu.matmul %61, %2, %cst_34 {dimension_numbers = #tpu.dot_dimension_numbers<[1], [0], [0], [1], [0, 0, 1, 1], [], []>} : vector<2x32xf32>, vector<32x32xf32>, vector<2x32xf32> -> vector<2x32xf32>
    %70 = arith.addf %69, %68 : vector<2x32xf32>
    %71 = math.tanh %70 : vector<2x32xf32>
    %cst_35 = arith.constant dense<0.000000e+00> : vector<2x32xf32>
    %72 = tpu.matmul %61, %1, %cst_35 {dimension_numbers = #tpu.dot_dimension_numbers<[1], [0], [0], [1], [0, 0, 1, 1], [], []>} : vector<2x32xf32>, vector<32x32xf32>, vector<2x32xf32> -> vector<2x32xf32>
    %73 = vector.broadcast %5 : vector<1x32xf32> to vector<2x32xf32>
    %74 = arith.addf %72, %73 : vector<2x32xf32>
    %cst_36 = arith.constant dense<0.000000e+00> : vector<2x32xf32>
    %75 = tpu.matmul %67, %3, %cst_36 {dimension_numbers = #tpu.dot_dimension_numbers<[1], [0], [0], [1], [0, 0, 1, 1], [], []>} : vector<2x32xf32>, vector<32x32xf32>, vector<2x32xf32> -> vector<2x32xf32>
    %76 = arith.addf %75, %74 : vector<2x32xf32>
    %77 = math.tanh %76 : vector<2x32xf32>
    %78 = vector.extract_strided_slice %9 {offsets = [14, 0], sizes = [2, 32], strides = [1, 1]} : vector<16x32xf32> to vector<2x32xf32>
    %cst_37 = arith.constant dense<0.000000e+00> : vector<2x32xf32>
    %79 = tpu.matmul %71, %2, %cst_37 {dimension_numbers = #tpu.dot_dimension_numbers<[1], [0], [0], [1], [0, 0, 1, 1], [], []>} : vector<2x32xf32>, vector<32x32xf32>, vector<2x32xf32> -> vector<2x32xf32>
    %80 = arith.addf %79, %78 : vector<2x32xf32>
    %81 = math.tanh %80 : vector<2x32xf32>
    %cst_38 = arith.constant dense<0.000000e+00> : vector<2x32xf32>
    %82 = tpu.matmul %71, %1, %cst_38 {dimension_numbers = #tpu.dot_dimension_numbers<[1], [0], [0], [1], [0, 0, 1, 1], [], []>} : vector<2x32xf32>, vector<32x32xf32>, vector<2x32xf32> -> vector<2x32xf32>
    %83 = vector.broadcast %5 : vector<1x32xf32> to vector<2x32xf32>
    %84 = arith.addf %82, %83 : vector<2x32xf32>
    %cst_39 = arith.constant dense<0.000000e+00> : vector<2x32xf32>
    %85 = tpu.matmul %77, %3, %cst_39 {dimension_numbers = #tpu.dot_dimension_numbers<[1], [0], [0], [1], [0, 0, 1, 1], [], []>} : vector<2x32xf32>, vector<32x32xf32>, vector<2x32xf32> -> vector<2x32xf32>
    %86 = arith.addf %85, %84 : vector<2x32xf32>
    %87 = math.tanh %86 : vector<2x32xf32>
    %cst_40 = arith.constant dense<0.000000e+00> : vector<2x32xf32>
    %88 = tpu.matmul %81, %1, %cst_40 {dimension_numbers = #tpu.dot_dimension_numbers<[1], [0], [0], [1], [0, 0, 1, 1], [], []>} : vector<2x32xf32>, vector<32x32xf32>, vector<2x32xf32> -> vector<2x32xf32>
    %89 = vector.broadcast %5 : vector<1x32xf32> to vector<2x32xf32>
    %90 = arith.addf %88, %89 : vector<2x32xf32>
    %cst_41 = arith.constant dense<0.000000e+00> : vector<2x32xf32>
    %91 = tpu.matmul %87, %3, %cst_41 {dimension_numbers = #tpu.dot_dimension_numbers<[1], [0], [0], [1], [0, 0, 1, 1], [], []>} : vector<2x32xf32>, vector<32x32xf32>, vector<2x32xf32> -> vector<2x32xf32>
    %92 = arith.addf %91, %90 : vector<2x32xf32>
    %93 = math.tanh %92 : vector<2x32xf32>
    %c0_42 = arith.constant 0 : index
    %c0_43 = arith.constant 0 : index
    %c0_44 = arith.constant 0 : index
    %94 = vector.load %arg11[%c0_42, %c0_43, %c0_44] : memref<2x2x32xf32, #tpu.memory_space<vmem>>, vector<1x2x32xf32>
    %95 = vector.shape_cast %94 : vector<1x2x32xf32> to vector<2x32xf32>
    %96 = vector.shape_cast %81 : vector<2x32xf32> to vector<1x2x32xf32>
    tpu.vector_store %arg11[%c0_42, %c0_43, %c0_44], %96 {strides = array<i32>} : memref<2x2x32xf32, #tpu.memory_space<vmem>>, vector<1x2x32xf32>,
    %c1_45 = arith.constant 1 : index
    %c0_46 = arith.constant 0 : index
    %c0_47 = arith.constant 0 : index
    %97 = vector.load %arg11[%c1_45, %c0_46, %c0_47] : memref<2x2x32xf32, #tpu.memory_space<vmem>>, vector<1x2x32xf32>
    %98 = vector.shape_cast %97 : vector<1x2x32xf32> to vector<2x32xf32>
    %99 = vector.shape_cast %93 : vector<2x32xf32> to vector<1x2x32xf32>
    tpu.vector_store %arg11[%c1_45, %c0_46, %c0_47], %99 {strides = array<i32>} : memref<2x2x32xf32, #tpu.memory_space<vmem>>, vector<1x2x32xf32>,
    %100 = tpu.concatenate %27, %37, %47, %57, %67, %77, %87, %93 in 0 : vector<2x32xf32>, vector<2x32xf32>, vector<2x32xf32>, vector<2x32xf32>, vector<2x32xf32>, vector<2x32xf32>, vector<2x32xf32>, vector<2x32xf32> -> vector<16x32xf32>
    %c0_48 = arith.constant 0 : index
    %c0_49 = arith.constant 0 : index
    %101 = vector.load %arg8[%c0_48, %c0_49] : memref<32x128xf32, #tpu.memory_space<vmem>>, vector<32x128xf32>
    %cst_50 = arith.constant dense<0.000000e+00> : vector<16x128xf32>
    %102 = tpu.matmul %100, %101, %cst_50 {dimension_numbers = #tpu.dot_dimension_numbers<[1], [0], [0], [1], [0, 0, 1, 1], [], []>} : vector<16x32xf32>, vector<32x128xf32>, vector<16x128xf32> -> vector<16x128xf32>
    %c0_51 = arith.constant 0 : index
    %c0_52 = arith.constant 0 : index
    %103 = vector.load %arg9[%c0_51, %c0_52] : memref<1x128xf32, #tpu.memory_space<vmem>>, vector<1x128xf32>
    %104 = vector.broadcast %103 : vector<1x128xf32> to vector<16x128xf32>
    %105 = arith.addf %102, %104 : vector<16x128xf32>
    %106 = tpu.iota {dimensions = array<i32: 1>} : vector<16x128xi32>
    %c3_i32 = arith.constant 3 : i32
    %107 = vector.broadcast %c3_i32 : i32 to vector<16x128xi32>
    %108 = arith.cmpi slt, %106, %107 : vector<16x128xi32>
    %c9_i32 = arith.constant 9 : i32
    %109 = vector.broadcast %c9_i32 : i32 to vector<16x128xi32>
    %110 = arith.cmpi sge, %106, %109 : vector<16x128xi32>
    %c15_i32 = arith.constant 15 : i32
    %111 = vector.broadcast %c15_i32 : i32 to vector<16x128xi32>
    %112 = arith.cmpi slt, %106, %111 : vector<16x128xi32>
    %113 = arith.andi %110, %112 : vector<16x128xi1>
    %c15_i32_53 = arith.constant 15 : i32
    %114 = vector.broadcast %c15_i32_53 : i32 to vector<16x128xi32>
    %115 = arith.cmpi sge, %106, %114 : vector<16x128xi32>
    %c18_i32 = arith.constant 18 : i32
    %116 = vector.broadcast %c18_i32 : i32 to vector<16x128xi32>
    %117 = arith.cmpi slt, %106, %116 : vector<16x128xi32>
    %118 = arith.andi %115, %117 : vector<16x128xi1>
    %cst_54 = arith.constant 0xFF800000 : f32
    %119 = vector.broadcast %cst_54 : f32 to vector<16x128xf32>
    %120 = arith.select %108, %105, %119 : vector<16x128xi1>, vector<16x128xf32>
    %cst_55 = arith.constant dense<0xFF800000> : vector<16xf32>
    %121 = vector.multi_reduction <maximumf>, %120, %cst_55 [1] : vector<16x128xf32> to vector<16xf32>
    %122 = vector.shape_cast %121 : vector<16xf32> to vector<16x1xf32>
    %123 = vector.broadcast %122 : vector<16x1xf32> to vector<16x128xf32>
    %124 = arith.subf %120, %123 : vector<16x128xf32>
    %125 = math.exp %124 : vector<16x128xf32>
    %cst_56 = arith.constant dense<0.000000e+00> : vector<16xf32>
    %126 = vector.multi_reduction <add>, %125, %cst_56 [1] : vector<16x128xf32> to vector<16xf32>
    %127 = vector.shape_cast %126 : vector<16xf32> to vector<16x1xf32>
    %128 = math.log %127 : vector<16x1xf32>
    %129 = arith.addf %128, %122 : vector<16x1xf32>
    %130 = vector.broadcast %129 : vector<16x1xf32> to vector<16x128xf32>
    %131 = arith.subf %105, %130 : vector<16x128xf32>
    %132 = arith.select %108, %131, %105 : vector<16x128xi1>, vector<16x128xf32>
    %133 = math.exp %105 : vector<16x128xf32>
    %134 = arith.select %113, %133, %132 : vector<16x128xi1>, vector<16x128xf32>
    %135 = math.tanh %105 : vector<16x128xf32>
    %136 = arith.select %118, %135, %134 : vector<16x128xi1>, vector<16x128xf32>
    %c0_57 = arith.constant 0 : index
    %c0_58 = arith.constant 0 : index
    %137 = vector.load %arg10[%c0_57, %c0_58] : memref<16x128xf32, #tpu.memory_space<vmem>>, vector<16x128xf32>
    tpu.vector_store %arg10[%c0_57, %c0_58], %136 {strides = array<i32>} : memref<16x128xf32, #tpu.memory_space<vmem>>, vector<16x128xf32>,
    return
  }
}

</mosaic_0001>

<bundles_post_ra>
// kernel: prediction_model_forward.1
= control target key start
LH: loop header
LB: loop body
LE: loop exit
PB: predicated region body
PF: predicated region fallthrough
CT: control target
= control target key end

     0   :  { %vm67_vm0 = vcmask 1043456   ;;  %vm60_vm1 = vcmask 31744   ;;  %v2759_v0 = vmov 0.0|0.0   ;;  %vm2760_vm2 = vmmov 0   ;;  %s3138_s3 = inlined_call_operand.vmem [shape: f32[32,32], index: 3, kind: input, shape index: {}]   ;;  %s3139_s2 = inlined_call_operand.vmem [shape: f32[4,32], index: 2, kind: input, shape index: {}]   ;;  %s3140_s0 = inlined_call_operand.vmem [shape: f32[16,4], index: 0, kind: input, shape index: {}]   ;;  %s3141_s1 = inlined_call_operand.vmem [shape: f32[2,2,32], index: 1, kind: input, shape index: {}, may-alias: {1,11}]   ;;  %s3142_s5 = inlined_call_operand.vmem [shape: f32[32,32], index: 5, kind: input, shape index: {}]   ;;  %s3143_s4 = inlined_call_operand.vmem [shape: f32[1,32], index: 4, kind: input, shape index: {}]   ;;  %s3144_s6 = inlined_call_operand.vmem [shape: f32[32,32], index: 6, kind: input, shape index: {}]   ;;  %s3145_s7 = inlined_call_operand.vmem [shape: f32[1,32], index: 7, kind: input, shape index: {}]   ;;  %s3146_s11 = inlined_call_operand.vmem [shape: f32[2,2,32], index: 11, kind: output, shape index: {1}, may-alias: {1,11}]   ;;  %s3147_s8 = inlined_call_operand.vmem [shape: f32[32,128], index: 8, kind: input, shape index: {}]   ;;  %s3148_s9 = inlined_call_operand.vmem [shape: f32[1,128], index: 9, kind: input, shape index: {}]   ;;  %s3149_s10 = inlined_call_operand.vmem [shape: f32[16,128], index: 10, kind: output, shape index: {0}]  }
   0x1   :  { %2532 = vmatprep.subr.bf16.mxu1 %v2759_v0  ;;  %v42_v1 = vld [vmem:[%s3138_s3] sm:$0xff]  ;;  %v43_v2 = vld [vmem:[%s3138_s3 + $0x8] sm:$0xff]  ;;  %v44_v7 = vld [vmem:[%s3138_s3 + $0x10] sm:$0xff]  ;;  %v2761_v8 = vmov 0.0   ;;  %vm149_vm3 = vcmask 261120   ;;  %vm1934_vm4 = vcmask 1041408  }
   0x2   :  { %v37_v3 = vld [vmem:[%s3139_s2] sm:$0xf]  ;;  %v2832_v4 = vpack.c.bf16 %v43_v2, %v42_v1  ;;  %v53_v6 = vld [vmem:[%s3140_s0 + $0x8] sm:$0xff]  ;;  %2265 = vmatprep.mubr.msk.f32.mxu1 %vm2760_vm2, %v2761_v8  ;;  %v45_v9 = vld [vmem:[%s3138_s3 + $0x18] sm:$0xff]  ;;  %vm1937_vm5 = vcmask 1045504   ;;  %vm1917_vm6 = vcmask 254976  }
   0x3   :  { %2252 = vmatprep.subr.msk.mxu0 %vm67_vm0, %v37_v3  ;;  %v52_v5 = vld [vmem:[%s3140_s0] sm:$0xff]  ;;  %v2853_v10 = vpack.c.bf16 %v45_v9, %v44_v7  ;;  %v39_v13 = vld [vmem:[%s3142_s5 + $0x8] sm:$0xff]  ;;  %v40_v14 = vld [vmem:[%s3142_s5 + $0x10] sm:$0xff] }
   0x4   :  { %2253 = vmatpush3.msk.msra.mxu0 %vm67_vm0, %v37_v3  ;;  %2254 = vmatprep.mubr.msk.f32.mxu0 %vm60_vm1, %v52_v5  ;;  %v146_v11 = vld [vmem:[%s3141_s1] sm:$0x3]  ;;  %v41_v16 = vld [vmem:[%s3142_s5 + $0x18] sm:$0xff]  ;;  %v47_v27 = vld [vmem:[%s3144_s6 + $0x8] sm:$0xff] }
   0x5   :  { %2534 = vmatpush3.bf16.msra.mxu1 %v2832_v4  ;;  %2255 = vmatmul.mubr.msk.f32.vlgmr.msra.gmra.mrb[0].mxu0 %vm60_vm1, %v53_v6  ;;  %v38_v12 = vld [vmem:[%s3142_s5] sm:$0xff]  ;;  %v2886_v17 = vpack.c.bf16 %v41_v16, %v40_v14  ;;  %v48_v29 = vld [vmem:[%s3144_s6 + $0x10] sm:$0xff]  ;;  %v49_v30 = vld [vmem:[%s3144_s6 + $0x18] sm:$0xff] }
   0x6   :  { %2535 = vmatprep.subr.bf16.mxu1 %v2759_v0  ;;  %2538 = vmatprep.subr.bf16.mxu0 %v2759_v0  ;;  %v2880_v15 = vpack.c.bf16 %v39_v13, %v38_v12  ;;  %v2089_v18 = vld [vmem:[%s3143_s4] ss:$0 sm:$0xff]  ;;  %v2916_v32 = vpack.c.bf16 %v49_v30, %v48_v29  ;;  %v2093_v33 = vld [vmem:[%s3141_s1 + $0x2] sm:$0x3] }
   0x7   :  { %2540 = vmatpush3.bf16.msra.mxu0 %v2832_v4  ;;  %2276 = vmatprep.mubr.msk.f32.mxu0 %vm2760_vm2, %v2761_v8  ;;  %v46_v26 = vld [vmem:[%s3144_s6] sm:$0xff] }
   0x8   :  { %2541 = vmatprep.subr.bf16.mxu0 %v2759_v0  ;;  %v2905_v28 = vpack.c.bf16 %v47_v27, %v46_v26  ;;  %v2943_v40 = vld [vmem:[%s3145_s7] ss:$0 sm:$0xff] }
   0x9   :  { %2537 = vmatpush3.bf16.msra.mxu1 %v2853_v10 }
   0xa   :  { %2544 = vmatprep.subr.bf16.mxu1 %v2759_v0 }
   0xb   :  { %2543 = vmatpush3.bf16.msra.mxu0 %v2853_v10 }
   0xc   :  { %2266 = vmatmul.mubr.msk.f32.vlgmr.msra.gmra.mrb[0].mxu1 %vm149_vm3, %v146_v11  ;;  %2556 = vmatprep.subr.bf16.mxu0 %v2759_v0 }
   0xd   :  { %2287 = vmatprep.mubr.msk.f32.mxu1 %vm2760_vm2, %v2761_v8  ;;  %2546 = vmatpush3.bf16.msra.mxu1 %v2880_v15 }
   0xe   :  { %2547 = vmatprep.subr.bf16.mxu1 %v2759_v0 }
  0x11   :  { %2549 = vmatpush3.bf16.msra.mxu1 %v2886_v17 }
  0x12   :  { %2550 = vmatprep.subr.bf16.mxu1 %v2759_v0 }
  0xd8   :  { %v2256_v19 = vpop.f32.mrb[0].mxu0 }
  0xd9   :  { %v2894_v20 = vadd.f32 %v2256_v19, %v2089_v18  ;;  %v137_v21 = vpop.f32.mrb[1].mxu0 }
  0xda   :  { %v2896_v22 = vadd.f32 %v2089_v18, %v137_v21 }
  0xdb   :  { %v1110_v18 = vrot.slane %v2894_v20, 2  ;;  %v1330_v26 = vrot.slane %v2894_v20, 4 }
  0xdc   :  { %v225_v34 = vrot.slane %v2896_v22, 2  ;;  %v451_v44 = vrot.slane %v2896_v22, 4  ;;  %v671_v53 = vrot.slane %v2896_v22, 6 }
  0xdf   :  { %v219_v23 = vpop.f32.mrb[0].mxu1 }
  0xe0   :  { %v220_v24 = vadd.f32 %v219_v23, %v2896_v22  ;;  %v2267_v25 = vpop.f32.mrb[1].mxu1 }
  0xe2   :  { %2711 = vtanh.f32 %v220_v24 }
  0xec   :  { %v2712_v31 = vpop.eup %2711 }
  0xed   :  { %2277 = vmatmul.mubr.msk.f32.vlgmr.msra.gmra.mrb[2].mxu0 %vm149_vm3, %v2712_v31  ;;  %2288 = vmatmul.mubr.msk.f32.vlgmr.msra.gmra.mrb[2].mxu1 %vm149_vm3, %v2712_v31 }
  0xee   :  { %2552 = vmatpush3.bf16.msra.mxu1 %v2905_v28  ;;  %2298 = vmatprep.mubr.msk.f32.mxu1 %vm2760_vm2, %v2761_v8 }
  0xef   :  { %2553 = vmatprep.subr.bf16.mxu1 %v2759_v0  ;;  %2558 = vmatpush3.bf16.msra.mxu0 %v2832_v4 }
  0xf0   :  { %2559 = vmatprep.subr.bf16.mxu0 %v2759_v0  ;;  %2309 = vmatprep.mubr.msk.f32.mxu0 %vm2760_vm2, %v2761_v8 }
  0xf2   :  { %2555 = vmatpush3.bf16.msra.mxu1 %v2916_v32 }
  0xf3   :  { %2561 = vmatpush3.bf16.msra.mxu0 %v2853_v10  ;;  %2574 = vmatprep.subr.bf16.mxu1 %v2759_v0 }
  0xf4   :  { %2562 = vmatprep.subr.bf16.mxu0 %v2759_v0 }
  0xf5   :  { %2299 = vmatmul.mubr.msk.f32.vlgmr.msra.gmra.mrb[2].mxu1 %vm149_vm3, %v2093_v33 }
  0xf6   :  { %2576 = vmatpush3.bf16.msra.mxu1 %v2832_v4  ;;  %2342 = vmatprep.mubr.msk.f32.mxu1 %vm2760_vm2, %v2761_v8 }
  0xf7   :  { %2577 = vmatprep.subr.bf16.mxu1 %v2759_v0 }
  0xfa   :  { %2579 = vmatpush3.bf16.msra.mxu1 %v2853_v10 }
  0xfb   :  { %2580 = vmatprep.subr.bf16.mxu1 %v2759_v0 }
 0x1c0   :  { %v296_v35 = vpop.f32.mrb[2].mxu0 }
 0x1c1   :  { %v297_v36 = vadd.f32 %v296_v35, %v225_v34  ;;  %v2278_v37 = vpop.f32.mrb[3].mxu0 }
 0x1c3   :  { %2713 = vtanh.f32 %v297_v36 }
 0x1c8   :  { %v446_v38 = vpop.f32.mrb[2].mxu1 }
 0x1c9   :  { %v2300_v39 = vpop.f32.mrb[3].mxu1  ;;  %v2684_v42 = vadd.f32 %v2943_v40, %v446_v38 }
 0x1cb   :  { %2715 = vtanh.f32 %v2684_v42 }
 0x1cd   :  { %v2714_v41 = vpop.eup %2713 }
 0x1ce   :  { %2310 = vmatmul.mubr.msk.f32.vlgmr.msra.gmra.mrb[4].mxu0 %vm149_vm3, %v2714_v41 }
 0x1cf   :  { %2564 = vmatpush3.bf16.msra.mxu0 %v2880_v15  ;;  %2320 = vmatprep.mubr.msk.f32.mxu0 %vm2760_vm2, %v2761_v8 }
 0x1d0   :  { %2565 = vmatprep.subr.bf16.mxu0 %v2759_v0 }
 0x1d3   :  { %2567 = vmatpush3.bf16.msra.mxu0 %v2886_v17 }
 0x1d4   :  { %2568 = vmatprep.subr.bf16.mxu0 %v2759_v0 }
 0x1d5   :  { %v2960_v43 = vpop.eup %2715 }
 0x1d6   :  { %2321 = vmatmul.mubr.msk.f32.vlgmr.msra.gmra.mrb[6].mxu0 %vm149_vm3, %v2714_v41 }
 0x1d7   :  { %2570 = vmatpush3.bf16.msra.mxu0 %v2905_v28  ;;  %2331 = vmatprep.mubr.msk.f32.mxu0 %vm2760_vm2, %v2761_v8 }
 0x1d8   :  { %2571 = vmatprep.subr.bf16.mxu0 %v2759_v0 }
 0x1db   :  { %2573 = vmatpush3.bf16.msra.mxu0 %v2916_v32 }
 0x1dc   :  { %2592 = vmatprep.subr.bf16.mxu0 %v2759_v0 }
 0x1de   :  { %2332 = vmatmul.mubr.msk.f32.vlgmr.msra.gmra.mrb[6].mxu0 %vm149_vm3, %v2960_v43 }
 0x1df   :  { %2594 = vmatpush3.bf16.msra.mxu0 %v2832_v4  ;;  %2375 = vmatprep.mubr.msk.f32.mxu0 %vm2760_vm2, %v2761_v8 }
 0x1e0   :  { %2595 = vmatprep.subr.bf16.mxu0 %v2759_v0 }
 0x1e3   :  { %2597 = vmatpush3.bf16.msra.mxu0 %v2853_v10 }
 0x1e4   :  { %2598 = vmatprep.subr.bf16.mxu0 %v2759_v0 }
 0x2a1   :  { %v522_v45 = vpop.f32.mrb[4].mxu0 }
 0x2a2   :  { %v523_v46 = vadd.f32 %v522_v45, %v451_v44  ;;  %v2311_v47 = vpop.f32.mrb[5].mxu0 }
 0x2a4   :  { %2717 = vtanh.f32 %v523_v46 }
 0x2ae   :  { %v2718_v48 = vpop.eup %2717 }
 0x2af   :  { %2343 = vmatmul.mubr.msk.f32.vlgmr.msra.gmra.mrb[4].mxu1 %vm149_vm3, %v2718_v48 }
 0x2b0   :  { %2582 = vmatpush3.bf16.msra.mxu1 %v2880_v15  ;;  %2353 = vmatprep.mubr.msk.f32.mxu1 %vm2760_vm2, %v2761_v8 }
 0x2b1   :  { %v666_v49 = vpop.f32.mrb[6].mxu0  ;;  %2583 = vmatprep.subr.bf16.mxu1 %v2759_v0 }
 0x2b2   :  { %v2685_v50 = vadd.f32 %v2943_v40, %v666_v49  ;;  %v2333_v51 = vpop.f32.mrb[7].mxu0 }
 0x2b4   :  { %2719 = vtanh.f32 %v2685_v50  ;;  %2585 = vmatpush3.bf16.msra.mxu1 %v2886_v17 }
 0x2b5   :  { %2586 = vmatprep.subr.bf16.mxu1 %v2759_v0 }
 0x2b7   :  { %2354 = vmatmul.mubr.msk.f32.vlgmr.msra.gmra.mrb[6].mxu1 %vm149_vm3, %v2718_v48  ;;  %v1945_v48 = vld [vmem:[%s3147_s8 + $0x18] sm:$0xff] }
 0x2b8   :  { %2588 = vmatpush3.bf16.msra.mxu1 %v2905_v28  ;;  %2364 = vmatprep.mubr.msk.f32.mxu1 %vm2760_vm2, %v2761_v8 }
 0x2b9   :  { %2589 = vmatprep.subr.bf16.mxu1 %v2759_v0 }
 0x2bc   :  { %2591 = vmatpush3.bf16.msra.mxu1 %v2916_v32 }
 0x2bd   :  { %2610 = vmatprep.subr.bf16.mxu1 %v2759_v0 }
 0x2be   :  { %v2720_v52 = vpop.eup %2719 }
 0x2bf   :  { %2365 = vmatmul.mubr.msk.f32.vlgmr.msra.gmra.mrb[6].mxu1 %vm149_vm3, %v2720_v52  ;;  %v1921_v61 = vrot.slane %v2720_v52, 6 }
 0x2c0   :  { %2612 = vmatpush3.bf16.msra.mxu1 %v2832_v4  ;;  %2408 = vmatprep.mubr.msk.f32.mxu1 %vm2760_vm2, %v2761_v8 }
 0x2c1   :  { %2613 = vmatprep.subr.bf16.mxu1 %v2759_v0  ;;  %v1935_v1 = vsel %vm1934_vm4, %v2960_v43, %v1921_v61 }
 0x2c4   :  { %2615 = vmatpush3.bf16.msra.mxu1 %v2853_v10 }
 0x2c5   :  { %2616 = vmatprep.subr.bf16.mxu1 %v2759_v0 }
 0x382   :  { %v742_v54 = vpop.f32.mrb[4].mxu1 }
 0x383   :  { %v743_v55 = vadd.f32 %v742_v54, %v671_v53  ;;  %v2344_v56 = vpop.f32.mrb[5].mxu1 }
 0x384   :  { %v2034_v56 = vlaneseq }
 0x385   :  { %2721 = vtanh.f32 %v743_v55 }
 0x38f   :  { %v2722_v57 = vpop.eup %2721 }
 0x390   :  { %2376 = vmatmul.mubr.msk.f32.vlgmr.msra.gmra.mrb[8].mxu0 %vm149_vm3, %v2722_v57 }
 0x391   :  { %2600 = vmatpush3.bf16.msra.mxu0 %v2880_v15  ;;  %2386 = vmatprep.mubr.msk.f32.mxu0 %vm2760_vm2, %v2761_v8 }
 0x392   :  { %v886_v58 = vpop.f32.mrb[6].mxu1  ;;  %2601 = vmatprep.subr.bf16.mxu0 %v2759_v0 }
 0x393   :  { %v2686_v59 = vadd.f32 %v2943_v40, %v886_v58  ;;  %v2366_v60 = vpop.f32.mrb[7].mxu1  ;;  %v2120_v58 = vld [vmem:[%s3148_s9] ss:$0 sm:$0xff] }
 0x395   :  { %2723 = vtanh.f32 %v2686_v59  ;;  %2603 = vmatpush3.bf16.msra.mxu0 %v2886_v17 }
 0x396   :  { %2604 = vmatprep.subr.bf16.mxu0 %v2759_v0 }
 0x398   :  { %2387 = vmatmul.mubr.msk.f32.vlgmr.msra.gmra.mrb[10].mxu0 %vm149_vm3, %v2722_v57  ;;  %v2035_v57 = vand.u32 127, %v2034_v56 }
 0x399   :  { %2606 = vmatpush3.bf16.msra.mxu0 %v2905_v28  ;;  %2397 = vmatprep.mubr.msk.f32.mxu0 %vm2760_vm2, %v2761_v8 }
 0x39a   :  { %2607 = vmatprep.subr.bf16.mxu0 %v2759_v0  ;;  %vm2036_vm7 = vcmp.lt.s32.totalorder %v2035_v57, 3  ;;  %vm2037_vm8 = vcmp.ge.s32.totalorder %v2035_v57, 9  ;;  %vm2038_vm9 = vcmp.lt.s32.totalorder %v2035_v57, 15  ;;  %vm2040_vm10 = vcmp.ge.s32.totalorder %v2035_v57, 15 }
 0x39b   :  { %vm2041_vm11 = vcmp.lt.s32.totalorder %v2035_v57, 18  ;;  %vm3122_vm12 = vmand %vm2037_vm8, %vm2038_vm9 }
 0x39c   :  { %vm2042_vm13 = vmand %vm2040_vm10, %vm2041_vm11 }
 0x39d   :  { %2609 = vmatpush3.bf16.msra.mxu0 %v2916_v32 }
 0x39e   :  { %2628 = vmatprep.subr.bf16.mxu0 %v2759_v0 }
 0x39f   :  { %v2724_v62 = vpop.eup %2723 }
 0x3a0   :  { %2398 = vmatmul.mubr.msk.f32.vlgmr.msra.gmra.mrb[10].mxu0 %vm149_vm3, %v2724_v62  ;;  %v1923_v63 = vrot.slane %v2724_v62, 4 }
 0x3a1   :  { %2630 = vmatpush3.bf16.msra.mxu0 %v2832_v4  ;;  %2441 = vmatprep.mubr.msk.f32.mxu0 %vm2760_vm2, %v2761_v8 }
 0x3a2   :  { %2631 = vmatprep.subr.bf16.mxu0 %v2759_v0  ;;  %v1936_v2 = vsel %vm67_vm0, %v1935_v1, %v1923_v63 }
 0x3a5   :  { %2633 = vmatpush3.bf16.msra.mxu0 %v2853_v10 }
 0x3a6   :  { %2634 = vmatprep.subr.bf16.mxu0 %v2759_v0 }
 0x463   :  { %v960_v3 = vpop.f32.mrb[8].mxu0 }
 0x464   :  { %v961_v5 = vadd.f32 %v960_v3, %v2894_v20  ;;  %v2377_v6 = vpop.f32.mrb[9].mxu0 }
 0x466   :  { %2725 = vtanh.f32 %v961_v5 }
 0x470   :  { %v2726_v7 = vpop.eup %2725 }
 0x471   :  { %2409 = vmatmul.mubr.msk.f32.vlgmr.msra.gmra.mrb[8].mxu1 %vm149_vm3, %v2726_v7 }
 0x472   :  { %2618 = vmatpush3.bf16.msra.mxu1 %v2880_v15  ;;  %2419 = vmatprep.mubr.msk.f32.mxu1 %vm2760_vm2, %v2761_v8 }
 0x473   :  { %v1104_v9 = vpop.f32.mrb[10].mxu0  ;;  %2619 = vmatprep.subr.bf16.mxu1 %v2759_v0 }
 0x474   :  { %v2687_v11 = vadd.f32 %v2943_v40, %v1104_v9  ;;  %v2399_v12 = vpop.f32.mrb[11].mxu0 }
 0x476   :  { %2727 = vtanh.f32 %v2687_v11  ;;  %2621 = vmatpush3.bf16.msra.mxu1 %v2886_v17 }
 0x477   :  { %2622 = vmatprep.subr.bf16.mxu1 %v2759_v0 }
 0x479   :  { %2420 = vmatmul.mubr.msk.f32.vlgmr.msra.gmra.mrb[10].mxu1 %vm149_vm3, %v2726_v7 }
 0x47a   :  { %2624 = vmatpush3.bf16.msra.mxu1 %v2905_v28  ;;  %2430 = vmatprep.mubr.msk.f32.mxu1 %vm2760_vm2, %v2761_v8 }
 0x47b   :  { %2625 = vmatprep.subr.bf16.mxu1 %v2759_v0 }
 0x47e   :  { %2627 = vmatpush3.bf16.msra.mxu1 %v2916_v32 }
 0x47f   :  { %2646 = vmatprep.subr.bf16.mxu1 %v2759_v0 }
 0x480   :  { %v2728_v13 = vpop.eup %2727 }
 0x481   :  { %2431 = vmatmul.mubr.msk.f32.vlgmr.msra.gmra.mrb[10].mxu1 %vm149_vm3, %v2728_v13  ;;  %v1925_v14 = vrot.slane %v2728_v13, 2 }
 0x482   :  { %2648 = vmatpush3.bf16.msra.mxu1 %v2832_v4  ;;  %2474 = vmatprep.mubr.msk.f32.mxu1 %vm2760_vm2, %v2761_v8 }
 0x483   :  { %2649 = vmatprep.subr.bf16.mxu1 %v2759_v0  ;;  %v1938_v16 = vsel %vm1937_vm5, %v1936_v2, %v1925_v14 }
 0x486   :  { %2651 = vmatpush3.bf16.msra.mxu1 %v2853_v10 }
 0x487   :  { %2652 = vmatprep.subr.bf16.mxu1 %v2759_v0 }
 0x544   :  { %v1181_v19 = vpop.f32.mrb[8].mxu1 }
 0x545   :  { %v1182_v21 = vadd.f32 %v1181_v19, %v1110_v18  ;;  %v2410_v22 = vpop.f32.mrb[9].mxu1 }
 0x547   :  { %2729 = vtanh.f32 %v1182_v21 }
 0x551   :  { %v2730_v23 = vpop.eup %2729 }
 0x552   :  { %2442 = vmatmul.mubr.msk.f32.vlgmr.msra.gmra.mrb[12].mxu0 %vm149_vm3, %v2730_v23 }
 0x553   :  { %2636 = vmatpush3.bf16.msra.mxu0 %v2880_v15  ;;  %2452 = vmatprep.mubr.msk.f32.mxu0 %vm2760_vm2, %v2761_v8 }
 0x554   :  { %v1325_v4 = vpop.f32.mrb[10].mxu1  ;;  %2637 = vmatprep.subr.bf16.mxu0 %v2759_v0 }
 0x555   :  { %v2688_v10 = vadd.f32 %v2943_v40, %v1325_v4  ;;  %v2432_v24 = vpop.f32.mrb[11].mxu1 }
 0x557   :  { %2731 = vtanh.f32 %v2688_v10  ;;  %2639 = vmatpush3.bf16.msra.mxu0 %v2886_v17 }
 0x558   :  { %2640 = vmatprep.subr.bf16.mxu0 %v2759_v0 }
 0x55a   :  { %2453 = vmatmul.mubr.msk.f32.vlgmr.msra.gmra.mrb[14].mxu0 %vm149_vm3, %v2730_v23 }
 0x55b   :  { %2642 = vmatpush3.bf16.msra.mxu0 %v2905_v28  ;;  %2463 = vmatprep.mubr.msk.f32.mxu0 %vm2760_vm2, %v2761_v8 }
 0x55c   :  { %2643 = vmatprep.subr.bf16.mxu0 %v2759_v0 }
 0x55f   :  { %2645 = vmatpush3.bf16.msra.mxu0 %v2916_v32 }
 0x560   :  { %2664 = vmatprep.subr.bf16.mxu0 %v2759_v0 }
 0x561   :  { %v2732_v25 = vpop.eup %2731 }
 0x562   :  { %2464 = vmatmul.mubr.msk.f32.vlgmr.msra.gmra.mrb[14].mxu0 %vm149_vm3, %v2732_v25 }
 0x563   :  { %2666 = vmatpush3.bf16.msra.mxu0 %v2880_v15  ;;  %2507 = vmatprep.mubr.msk.f32.mxu0 %vm2760_vm2, %v2761_v8 }
 0x564   :  { %2667 = vmatprep.subr.bf16.mxu0 %v2759_v0 }
 0x567   :  { %2669 = vmatpush3.bf16.msra.mxu0 %v2886_v17 }
 0x568   :  { %2670 = vmatprep.subr.bf16.mxu0 %v2759_v0 }
 0x625   :  { %v1401_v27 = vpop.f32.mrb[12].mxu0 }
 0x626   :  { %v1402_v29 = vadd.f32 %v1401_v27, %v1330_v26  ;;  %v2443_v30 = vpop.f32.mrb[13].mxu0 }
 0x628   :  { %2733 = vtanh.f32 %v1402_v29 }
 0x632   :  { %v2734_v31 = vpop.eup %2733 }
 0x633   :  { %2475 = vmatmul.mubr.msk.f32.vlgmr.msra.gmra.mrb[12].mxu1 %vm149_vm3, %v2734_v31 }
 0x634   :  { %2654 = vmatpush3.bf16.msra.mxu1 %v2880_v15  ;;  %2485 = vmatprep.mubr.msk.f32.mxu1 %vm2760_vm2, %v2761_v8 }
 0x635   :  { %v1545_v33 = vpop.f32.mrb[14].mxu0  ;;  %2655 = vmatprep.subr.bf16.mxu1 %v2759_v0 }
 0x636   :  { %v2689_v34 = vadd.f32 %v2943_v40, %v1545_v33  ;;  %v2465_v35 = vpop.f32.mrb[15].mxu0 }
 0x638   :  { %2735 = vtanh.f32 %v2689_v34  ;;  %2657 = vmatpush3.bf16.msra.mxu1 %v2886_v17  ;;  %v1550_v17 = vrot.slane %v2894_v20, 6 }
 0x639   :  { %2658 = vmatprep.subr.bf16.mxu1 %v2759_v0 }
 0x63b   :  { %2486 = vmatmul.mubr.msk.f32.vlgmr.msra.gmra.mrb[14].mxu1 %vm149_vm3, %v2734_v31 }
 0x63c   :  { %2660 = vmatpush3.bf16.msra.mxu1 %v2905_v28  ;;  %2496 = vmatprep.mubr.msk.f32.mxu1 %vm2760_vm2, %v2761_v8 }
 0x63d   :  { %2661 = vmatprep.subr.bf16.mxu1 %v2759_v0 }
 0x640   :  { %2663 = vmatpush3.bf16.msra.mxu1 %v2916_v32 }
 0x642   :  { %v2736_v15 = vpop.eup %2735 }
 0x643   :  { %2497 = vmatmul.mubr.msk.f32.vlgmr.msra.gmra.mrb[14].mxu1 %vm149_vm3, %v2736_v15  ;;  %v1927_v43 = vrot.slane %v2736_v15, 6 }
 0x644   :  { %2529 = vmatprep.mubr.msk.f32.mxu1 %vm149_vm3, %v1938_v16 }
 0x645   :  { %v1939_v46 = vsel %vm1934_vm4, %v2732_v25, %v1927_v43 }
 0x706   :  { %v1621_v36 = vpop.f32.mrb[12].mxu1 }
 0x707   :  { %v1622_v37 = vadd.f32 %v1621_v36, %v1550_v17  ;;  %v2476_v38 = vpop.f32.mrb[13].mxu1 }
 0x709   :  { %2737 = vtanh.f32 %v1622_v37 }
 0x713   :  { %v2738_v39 = vpop.eup %2737 }
 0x714   :  { %1918 = vst.msk [vmem:[%s3146_s11] sm:$0x3] %vm1917_vm6, %v2738_v39  ;;  %2508 = vmatmul.mubr.msk.f32.vlgmr.msra.gmra.mrb[16].mxu0 %vm149_vm3, %v2738_v39 }
 0x715   :  { %2672 = vmatpush3.bf16.msra.mxu0 %v2905_v28  ;;  %2518 = vmatprep.mubr.msk.f32.mxu0 %vm2760_vm2, %v2761_v8  ;;  %v1942_v8 = vld [vmem:[%s3147_s8] sm:$0xff] }
 0x716   :  { %v1765_v41 = vpop.f32.mrb[14].mxu1  ;;  %2673 = vmatprep.subr.bf16.mxu0 %v2759_v0  ;;  %v1943_v0 = vld [vmem:[%s3147_s8 + $0x8] sm:$0xff] }
 0x717   :  { %v2690_v20 = vadd.f32 %v2943_v40, %v1765_v41  ;;  %v2498_v42 = vpop.f32.mrb[15].mxu1  ;;  %v2676_v47 = vpack.c.bf16 %v1943_v0, %v1942_v8 }
 0x719   :  { %2739 = vtanh.f32 %v2690_v20  ;;  %2675 = vmatpush3.bf16.msra.mxu0 %v2916_v32  ;;  %2677 = vmatprep.subr.bf16.mxu1 %v2676_v47  ;;  %v1944_v32 = vld [vmem:[%s3147_s8 + $0x10] sm:$0xff] }
 0x71a   :  { %2679 = vmatpush3.bf16.msra.mxu1 %v2676_v47  ;;  %v2680_v49 = vpack.c.bf16 %v1945_v48, %v1944_v32 }
 0x71c   :  { %2681 = vmatprep.subr.bf16.mxu1 %v2680_v49 }
 0x71e   :  { %2683 = vmatpush3.bf16.msra.mxu1 %v2680_v49 }
 0x723   :  { %v2740_v44 = vpop.eup %2739 }
 0x724   :  { %v1929_v45 = vrot.slane %v2740_v44, 4  ;;  %2519 = vmatmul.mubr.msk.f32.vlgmr.msra.gmra.mrb[16].mxu0 %vm149_vm3, %v2740_v44 }
 0x726   :  { %v1940_v28 = vsel %vm67_vm0, %v1939_v46, %v1929_v45 }
 0x7f7   :  { %v1912_v50 = vpop.f32.mrb[16].mxu0 }
 0x7f8   :  { %v2691_v51 = vadd.f32 %v2943_v40, %v1912_v50  ;;  %v2520_v52 = vpop.f32.mrb[17].mxu0 }
 0x7fa   :  { %2741 = vtanh.f32 %v2691_v51 }
 0x804   :  { %v2742_v53 = vpop.eup %2741 }
 0x805   :  { %2119 = vst.msk [vmem:[%s3146_s11 + $0x2] sm:$0x3] %vm1917_vm6, %v2742_v53  ;;  %v1932_v54 = vrot.slane %v2742_v53, 2 }
 0x807   :  { %v1941_v55 = vsel %vm1937_vm5, %v1940_v28, %v1932_v54 }
 0x808   :  { %2530 = vmatmul.mubr.msk.f32.vlgmr.msra.gmra.mrb[16].mxu1 %vm149_vm3, %v1941_v55 }
 0x8db   :  { %v2531_v40 = vpop.f32.mrb[16].mxu1 }
 0x8dc   :  { %v2025_v59 = vpop.f32.mrb[17].mxu1  ;;  %v2031_v61 = vadd.f32 %v2531_v40, %v2120_v58 }
 0x8dd   :  { %v2026_v60 = vadd.f32 %v2120_v58, %v2025_v59 }
 0x8de   :  { %v2044_v63 = vsel %vm2036_vm7, %v2031_v61, -inf  ;;  %v2071_v16 = vmul.f32 1.442695, %v2031_v61 }
 0x8df   :  { %v2043_v62 = vsel %vm2036_vm7, %v2026_v60, -inf  ;;  %v2069_v13 = vmul.f32 1.442695, %v2026_v60 }
 0x8e0   :  { %2045 = vmax.xlane.f32.xlu0 %v2043_v62 }
 0x8e4   :  { %2047 = vmax.xlane.f32.xlu0 %v2044_v63 }
 0x96d   :  { %v2046_v1 = vpop.xlane.xlu0 %2045 }
 0x96e   :  { %v2049_v2 = vsub.f32 %v2043_v62, %v2046_v1 }
 0x970   :  { %v2051_v3 = vmul.f32 1.442695, %v2049_v2 }
 0x971   :  { %v2048_v5 = vpop.xlane.xlu0 %2047 }
 0x972   :  { %v2050_v6 = vsub.f32 %v2044_v63, %v2048_v5  ;;  %2743 = vpow2.f32 %v2051_v3 }
 0x974   :  { %v2053_v7 = vmul.f32 1.442695, %v2050_v6 }
 0x976   :  { %2745 = vpow2.f32 %v2053_v7 }
 0x97c   :  { %v2744_v9 = vpop.eup %2743 }
 0x97d   :  { %2055 = vadd.xlane.f32.xlu1 %v2744_v9 }
 0x980   :  { %v2746_v11 = vpop.eup %2745 }
 0x981   :  { %2057 = vadd.xlane.f32.xlu1 %v2746_v11 }
 0xa0a   :  { %v2056_v12 = vpop.xlane.xlu1 %2055 }
 0xa0b   :  { %2747 = vlog2.f32 %v2056_v12 }
 0xa0e   :  { %v2058_v14 = vpop.xlane.xlu1 %2057 }
 0xa0f   :  { %2749 = vlog2.f32 %v2058_v14 }
 0xa10   :  { %2751 = vpow2.f32 %v2069_v13 }
 0xa11   :  { %2753 = vtanh.f32 %v2026_v60 }
 0xa12   :  { %2755 = vpow2.f32 %v2071_v16 }
 0xa13   :  { %2757 = vtanh.f32 %v2031_v61 }
 0xa15   :  { %v2748_v18 = vpop.eup %2747 }
 0xa16   :  { %v2060_v19 = vmul.f32 0.6931472, %v2748_v18 }
 0xa18   :  { %v2063_v21 = vadd.f32 %v2060_v19, %v2046_v1 }
 0xa19   :  { %v2750_v22 = vpop.eup %2749 }
 0xa1a   :  { %v2065_v4 = vsub.f32 %v2026_v60, %v2063_v21  ;;  %v2062_v10 = vmul.f32 0.6931472, %v2750_v22  ;;  %v2752_v24 = vpop.eup %2751 }
 0xa1b   :  { %v2754_v27 = vpop.eup %2753 }
 0xa1c   :  { %v2067_v25 = vsel %vm2036_vm7, %v2065_v4, %v2026_v60  ;;  %v2064_v26 = vadd.f32 %v2062_v10, %v2048_v5  ;;  %v2756_v33 = vpop.eup %2755 }
 0xa1d   :  { %v2073_v29 = vsel %vm3122_vm12, %v2752_v24, %v2067_v25  ;;  %v2758_v35 = vpop.eup %2757 }
 0xa1e   :  { %v2077_v30 = vsel %vm2042_vm13, %v2754_v27, %v2073_v29  ;;  %v2066_v31 = vsub.f32 %v2031_v61, %v2064_v26 }
 0xa1f   :  { %2079 = vst [vmem:[%s3149_s10] sm:$0xff] %v2077_v30 }
 0xa20   :  { %v2068_v34 = vsel %vm2036_vm7, %v2066_v31, %v2031_v61 }
 0xa21   :  { %v2074_v15 = vsel %vm3122_vm12, %v2756_v33, %v2068_v34 }
 0xa22   :  { %v2078_v17 = vsel %vm2042_vm13, %v2758_v35, %v2074_v15 }
 0xa23   :  { %2080 = vst [vmem:[%s3149_s10 + $0x8] sm:$0xff] %v2078_v17 }

</bundles_post_ra>
